<compile_context>
chip_gen: v7x
topology: tpu7x:2x2x1
jax: 0.10.0
libtpu: 0.0.40
codegen_flags: <defaults>
</compile_context>

<pallas_src>
import jax
import jax.numpy as jnp
from jax import lax
from jax.experimental import pallas as pl
from jax.experimental.pallas import tpu as pltpu


_SELU_ALPHA = 1.6732632423543772
_SELU_SCALE = 1.0507009873554805


# ----------------------------------------------------------------------------
# helpers
# ----------------------------------------------------------------------------

def _round_up(x, m):
    return ((x + m - 1) // m) * m


def _tile_dim(dim, max_block):
    """Return (block, padded_dim, n_blocks) for one dimension.

    If the dimension fits in a single block we use the full (possibly
    unaligned) extent -- a block equal to the full array dim is always legal,
    so no padding is needed.  Otherwise we tile with `max_block` (already a
    multiple of the required alignment) and pad up."""
    if dim <= max_block:
        return dim, dim, 1
    padded = _round_up(dim, max_block)
    return max_block, padded, padded // max_block


def _pad_to(a, rows, cols):
    r, c = a.shape
    if (r, c) == (rows, cols):
        return a
    return jnp.zeros((rows, cols), a.dtype).at[:r, :c].set(a)


def l2normalize(v, eps=1e-12):
    return v / (jnp.linalg.norm(v) + eps)


def spectral_sigma(w, u, power_iterations=1):
    """One SpectralNorm forward: power-iterate (u, v), return (sigma, new_u)."""
    h = w.shape[0]
    wm = w.reshape(h, -1)
    v = None
    for _ in range(power_iterations):
        v = l2normalize(jnp.matmul(wm.T, u))
        u = l2normalize(jnp.matmul(wm, v))
    sigma = jnp.dot(u, jnp.matmul(wm, v))
    return sigma, u


# ----------------------------------------------------------------------------
# kernels
# ----------------------------------------------------------------------------

def _apply_activation(y, activation, alpha):
    if activation == "relu":
        return jnp.maximum(y, 0.0)
    if activation == "lrelu":
        return jnp.where(y > 0, y, 0.2 * y)
    if activation == "prelu":
        return jnp.where(y > 0, y, alpha * y)
    if activation == "selu":
        return _SELU_SCALE * jnp.where(
            y > 0, y, _SELU_ALPHA * (jnp.exp(y) - 1.0))
    if activation == "tanh":
        return jnp.tanh(y)
    return y  # "none"


def _make_matmul_kernel(norm, activation, n_features, fuse_epilogue):
    """Fused  y = (x @ W^T) [* 1/sigma] + b  -> [ln] -> activation.

    Ref order: scalars(SMEM), x, wt, b, [gamma, beta], out, acc(scratch).
    `norm` is 'none' | 'sn' | 'ln' here ('bn' runs this kernel with
    fuse_epilogue=False plus the separate batch-norm kernel)."""
    use_ln = fuse_epilogue and norm == "ln"

    def kernel(*refs):
        scalars_ref, x_ref, wt_ref, b_ref = refs[:4]
        idx = 4
        gamma_ref = beta_ref = None
        if use_ln:
            gamma_ref, beta_ref = refs[idx], refs[idx + 1]
            idx += 2
        o_ref, acc_ref = refs[idx], refs[idx + 1]

        k = pl.program_id(2)

        @pl.when(k == 0)
        def _init():
            acc_ref[...] = jnp.zeros_like(acc_ref)

        # bf16 operands, f32 accumulation on the MXU.
        acc_ref[...] += jnp.dot(x_ref[...], wt_ref[...],
                                preferred_element_type=jnp.float32)

        @pl.when(k == pl.num_programs(2) - 1)
        def _epilogue():
            y = acc_ref[...]
            if norm == "sn":
                y = y * scalars_ref[0]          # 1/sigma (SMEM scalar)
            y = y + b_ref[...]
            if use_ln:
                # Custom LayerNorm of the reference module: per-sample stats
                # over the feature row, unbiased std, divide by (std + eps).
                # 'ln' always uses a single (full) N tile, so the whole row is
                # in this block and no padding mask is needed.
                nf = float(n_features)
                mean = jnp.sum(y, axis=1, keepdims=True) * (1.0 / nf)
                diff = y - mean
                # guard nf==1 only to avoid a literal divide-by-zero
                # (pathological; PyTorch would produce NaN there).
                var = jnp.sum(diff * diff, axis=1, keepdims=True) * (
                    1.0 / max(nf - 1.0, 1.0))
                y = diff * pl.reciprocal(jnp.sqrt(var) + 1e-5, approx=True)
                y = y * gamma_ref[...] + beta_ref[...]
            if fuse_epilogue:
                y = _apply_activation(y, activation, scalars_ref[1])
            o_ref[...] = y.astype(o_ref.dtype)

    return kernel


def _make_batchnorm_kernel(activation, m_true, m_rows):
    """BatchNorm1d (training-mode batch stats) + activation over one N tile.

    Ref order: scalars(SMEM), y, gamma, beta, out."""
    need_mask = m_rows != m_true          # statically gated padding mask
    inv_cnt = 1.0 / float(m_true)

    def kernel(scalars_ref, y_ref, gamma_ref, beta_ref, o_ref):
        y = y_ref[...]
        if need_mask:
            row = lax.broadcasted_iota(jnp.int32, y.shape, 0)
            valid = row < m_true
            mean = jnp.sum(jnp.where(valid, y, 0.0), axis=0,
                           keepdims=True) * inv_cnt
            diff = jnp.where(valid, y - mean, 0.0)
        else:
            mean = jnp.sum(y, axis=0, keepdims=True) * inv_cnt
            diff = y - mean
        var = jnp.sum(diff * diff, axis=0, keepdims=True) * inv_cnt
        yn = (y - mean) * lax.rsqrt(var + 1e-5)
        yn = yn * gamma_ref[...] + beta_ref[...]
        yn = _apply_activation(yn, activation, scalars_ref[1])
        o_ref[...] = yn

    return kernel


# ----------------------------------------------------------------------------
# one-time parameter preparation (hoisted out of the per-call path)
# ----------------------------------------------------------------------------

def prepare_linear_block(params, *, norm="none", activation="relu",
                         block_m=256, block_n=512, block_k=1024):
    assert norm in ("none", "sn", "ln", "bn"), f"unsupported norm: {norm}"
    assert activation in ("relu", "lrelu", "prelu", "selu", "tanh", "none")
    assert block_m % 8 == 0 and block_n % 128 == 0 and block_k % 128 == 0

    w = jnp.asarray(params["w"], jnp.float32)      # (out, in) nn.Linear layout
    b = jnp.asarray(params["b"], jnp.float32)
    N, K = w.shape

    tk, Kp, n_k = _tile_dim(K, block_k)
    if norm == "ln":
        # row statistics need the full feature row resident -> single N tile.
        tn, Np, n_n = N, N, 1
    else:
        tn, Np, n_n = _tile_dim(N, block_n)

    prep = {
        "norm": norm, "activation": activation,
        "N": N, "K": K, "Kp": Kp, "Np": Np,
        "tk": tk, "tn": tn, "n_k": n_k, "n_n": n_n,
        "block_m": block_m,
        # pre-transposed, padded, bf16 weight: lane dim = output features.
        "wt": _pad_to(jnp.transpose(w), Kp, Np).astype(jnp.bfloat16),
        "b": _pad_to(b.reshape(1, N), 1, Np),
    }
    if norm in ("ln", "bn"):
        prep["gamma"] = _pad_to(
            jnp.asarray(params["gamma"], jnp.float32).reshape(1, N), 1, Np)
        prep["beta"] = _pad_to(
            jnp.asarray(params["beta"], jnp.float32).reshape(1, N), 1, Np)
    if norm == "sn":
        prep["w_raw"] = w                          # power iteration reads this
        prep["u0"] = jnp.asarray(params["u"], jnp.float32)
    prep["prelu_a"] = (jnp.asarray(params["prelu_a"], jnp.float32)
                       if activation == "prelu" else jnp.float32(0.0))
    return prep


# ----------------------------------------------------------------------------
# forward pass
# ----------------------------------------------------------------------------

def linear_block_forward(prep, x, state=None):
    """Forward of LinearBlock.  Returns (out, new_state); new_state carries the
    updated spectral-norm `u` so the power iteration advances across calls."""
    norm, activation = prep["norm"], prep["activation"]
    N, K, Kp, Np = prep["N"], prep["K"], prep["Kp"], prep["Np"]
    tk, tn, n_k, n_n = prep["tk"], prep["tn"], prep["n_k"], prep["n_n"]

    M = x.shape[0]
    assert x.shape[1] == K
    tm, Mp, n_m = _tile_dim(M, prep["block_m"])

    new_state = {}
    inv_sigma = jnp.float32(1.0)
    if norm == "sn":
        u = prep["u0"] if state is None else state.get("u", prep["u0"])
        sigma, u_new = spectral_sigma(prep["w_raw"], u)
        inv_sigma = (1.0 / sigma).astype(jnp.float32)
        new_state["u"] = u_new

    # runtime scalars -> SMEM: [1/sigma, prelu alpha]
    scalars = jnp.stack([jnp.asarray(inv_sigma, jnp.float32),
                         jnp.asarray(prep["prelu_a"], jnp.float32)])

    # pad only when strictly required; bf16 operands for the MXU.
    x_p = _pad_to(x.astype(jnp.float32), Mp, Kp).astype(jnp.bfloat16)

    smem_spec = pl.BlockSpec(memory_space=pltpu.MemorySpace.SMEM)
    in_specs = [
        smem_spec,
        pl.BlockSpec((tm, tk), lambda i, j, k: (i, k)),
        pl.BlockSpec((tk, tn), lambda i, j, k: (k, j)),
        pl.BlockSpec((1, tn), lambda i, j, k: (0, j)),
    ]
    inputs = [scalars, x_p, prep["wt"], prep["b"]]

    fuse_epilogue = norm != "bn"
    if fuse_epilogue and norm == "ln":
        in_specs += [pl.BlockSpec((1, tn), lambda i, j, k: (0, j)),
                     pl.BlockSpec((1, tn), lambda i, j, k: (0, j))]
        inputs += [prep["gamma"], prep["beta"]]

    y = pl.pallas_call(
        _make_matmul_kernel(norm, activation, N, fuse_epilogue),
        out_shape=jax.ShapeDtypeStruct((Mp, Np), jnp.float32),
        grid=(n_m, n_n, n_k),
        in_specs=in_specs,
        out_specs=pl.BlockSpec((tm, tn), lambda i, j, k: (i, j)),
        scratch_shapes=[pltpu.VMEM((tm, tn), jnp.float32)],
        compiler_params=pltpu.CompilerParams(
            dimension_semantics=("parallel", "parallel", "arbitrary")),
    )(*inputs)

    if norm == "bn":
        # pass 2: batch statistics per feature tile + affine + activation.
        # Only an (M, tn) slab is resident per step -- the weight never shares
        # VMEM with the whole batch.
        y = pl.pallas_call(
            _make_batchnorm_kernel(activation, M, Mp),
            out_shape=jax.ShapeDtypeStruct((Mp, Np), jnp.float32),
            grid=(n_n,),
            in_specs=[smem_spec,
                      pl.BlockSpec((Mp, tn), lambda j: (0, j)),
                      pl.BlockSpec((1, tn), lambda j: (0, j)),
                      pl.BlockSpec((1, tn), lambda j: (0, j))],
            out_specs=pl.BlockSpec((Mp, tn), lambda j: (0, j)),
            compiler_params=pltpu.CompilerParams(
                dimension_semantics=("parallel",)),
        )(scalars, y, prep["gamma"], prep["beta"])

    if (Mp, Np) != (M, N):
        y = y[:M, :N]
    return y, new_state


# ----------------------------------------------------------------------------
# parameter init + pure-JAX reference (mirrors the kernel's bf16 rounding)
# ----------------------------------------------------------------------------

def init_params(key, input_dim, output_dim, norm, activation):
    kw, kb, ku, kg = jax.random.split(key, 4)
    p = {
        "w": jax.random.normal(kw, (output_dim, input_dim), jnp.float32)
        * (1.0 / float(input_dim) ** 0.5),
        "b": jax.random.normal(kb, (output_dim,), jnp.float32) * 0.1,
    }
    if norm == "sn":
        p["u"] = l2normalize(jax.random.normal(ku, (output_dim,), jnp.float32))
    if norm == "ln":
        p["gamma"] = jax.random.uniform(kg, (output_dim,), jnp.float32)
        p["beta"] = jnp.zeros((output_dim,), jnp.float32)
    if norm == "bn":
        p["gamma"] = jnp.ones((output_dim,), jnp.float32)
        p["beta"] = jnp.zeros((output_dim,), jnp.float32)
    if activation == "prelu":
        p["prelu_a"] = jnp.asarray(0.25, jnp.float32)
    return p


def linear_block_reference(params, x, norm, activation):
    w = jnp.asarray(params["w"], jnp.float32)
    b = jnp.asarray(params["b"], jnp.float32)
    xb = x.astype(jnp.bfloat16).astype(jnp.float32)
    wb = w.astype(jnp.bfloat16).astype(jnp.float32)
    y = xb @ wb.T
    if norm == "sn":
        sigma, _ = spectral_sigma(w, params["u"])
        y = y / sigma
    y = y + b[None, :]
    if norm == "ln":
        mean = jnp.mean(y, axis=1, keepdims=True)
        std = jnp.std(y, axis=1, keepdims=True, ddof=1)
        y = (y - mean) / (std + 1e-5)
        y = y * params["gamma"][None, :] + params["beta"][None, :]
    elif norm == "bn":
        mean = jnp.mean(y, axis=0, keepdims=True)
        var = jnp.mean((y - mean) ** 2, axis=0, keepdims=True)
        y = (y - mean) / jnp.sqrt(var + 1e-5)
        y = y * params["gamma"][None, :] + params["beta"][None, :]
    if activation == "relu":
        y = jnp.maximum(y, 0.0)
    elif activation == "lrelu":
        y = jnp.where(y > 0, y, 0.2 * y)
    elif activation == "prelu":
        y = jnp.where(y > 0, y, params["prelu_a"] * y)
    elif activation == "selu":
        y = _SELU_SCALE * jnp.where(y > 0, y, _SELU_ALPHA * (jnp.exp(y) - 1.0))
    elif activation == "tanh":
        y = jnp.tanh(y)
    return y


# ----------------------------------------------------------------------------
# demo
# ----------------------------------------------------------------------------

if __name__ == "__main__":
    root = jax.random.PRNGKey(0)
    kx1, kx2, kp = jax.random.split(root, 3)

    configs = [("none", "relu"), ("ln", "tanh"), ("sn", "lrelu"),
               ("bn", "none"), ("none", "prelu"), ("ln", "selu")]

    # Case A: aligned shapes, small blocks -> exercises the (M, N, K)-tiled
    # grid, the f32 accumulator, and the two-pass batch norm.
    M, K, N = 16, 256, 256
    x = jax.random.normal(kx1, (M, K), jnp.float32)
    for idx, (norm, act) in enumerate(configs):
        params = init_params(jax.random.fold_in(kp, idx), K, N, norm, act)
        prep = prepare_linear_block(params, norm=norm, activation=act,
                                    block_m=8, block_n=128, block_k=128)
        out, _ = linear_block_forward(prep, x)
        out = jax.block_until_ready(out)
        ref = linear_block_reference(params, x, norm, act)
        assert out.shape == (M, N) and out.dtype == jnp.float32
        assert bool(jnp.all(jnp.isfinite(out)))
        err = float(jnp.max(jnp.abs(out - ref)))
        assert err < 2e-2, (norm, act, err)

    # Case B: small unaligned shapes -> single full-extent blocks, no padding,
    # no output slice.
    M2, K2, N2 = 5, 48, 96
    x2 = jax.random.normal(kx2, (M2, K2), jnp.float32)
    for idx, (norm, act) in enumerate(configs):
        params = init_params(jax.random.fold_in(kp, 100 + idx),
                             K2, N2, norm, act)
        prep = prepare_linear_block(params, norm=norm, activation=act)
        out, _ = linear_block_forward(prep, x2)
        out = jax.block_until_ready(out)
        ref = linear_block_reference(params, x2, norm, act)
        assert out.shape == (M2, N2) and out.dtype == jnp.float32
        assert bool(jnp.all(jnp.isfinite(out)))
        err = float(jnp.max(jnp.abs(out - ref)))
        assert err < 2e-2, (norm, act, err)

    print("KERNEL_OK")
</pallas_src>

<mosaic_0001>
module attributes {stable_mosaic.version = 11 : i64} {
  func.func @kernel(%arg0: i32, %arg1: i32, %arg2: i32, %arg3: memref<2xf32, #tpu.memory_space<smem>>, %arg4: memref<8x128xbf16, #tpu.memory_space<vmem>>, %arg5: memref<128x128xbf16, #tpu.memory_space<vmem>>, %arg6: memref<1x128xf32, #tpu.memory_space<vmem>>, %arg7: memref<8x128xf32, #tpu.memory_space<vmem>>, %arg8: memref<8x128xf32, #tpu.memory_space<vmem>>) attributes {dimension_semantics = [#tpu.dimension_semantics<parallel>, #tpu.dimension_semantics<parallel>, #tpu.dimension_semantics<arbitrary>], iteration_bounds = array<i64: 2, 2, 2>, scalar_prefetch = 0 : i64, scratch_operands = 1 : i64, tpu.core_type = #tpu.core_type<tc>, window_params = [{transform_indices = @transform_0, window_bounds = array<i64: 2>}, {transform_indices = @transform_1, window_bounds = array<i64: 8, 128>}, {transform_indices = @transform_2, window_bounds = array<i64: 128, 128>}, {transform_indices = @transform_3, window_bounds = array<i64: 1, 128>}, {transform_indices = @transform_4, window_bounds = array<i64: 8, 128>}]} {
    %c0_i32 = arith.constant 0 : i32
    %0 = arith.cmpi eq, %arg2, %c0_i32 : i32
    %1 = arith.extui %0 : i1 to i32
    %c0_i32_0 = arith.constant 0 : i32
    %2 = arith.cmpi ne, %1, %c0_i32_0 : i32
    scf.if %2 {
      %cst_9 = arith.constant 0.000000e+00 : f32
      %12 = vector.broadcast %cst_9 : f32 to vector<8x128xf32>
      %c0_10 = arith.constant 0 : index
      %c0_11 = arith.constant 0 : index
      %13 = vector.load %arg8[%c0_10, %c0_11] : memref<8x128xf32, #tpu.memory_space<vmem>>, vector<8x128xf32>
      tpu.vector_store %arg8[%c0_10, %c0_11], %12 {strides = array<i32>} : memref<8x128xf32, #tpu.memory_space<vmem>>, vector<8x128xf32>,
    } else {
    }
    %c0 = arith.constant 0 : index
    %c0_1 = arith.constant 0 : index
    %3 = vector.load %arg8[%c0, %c0_1] : memref<8x128xf32, #tpu.memory_space<vmem>>, vector<8x128xf32>
    %c0_2 = arith.constant 0 : index
    %c0_3 = arith.constant 0 : index
    %4 = vector.load %arg4[%c0_2, %c0_3] : memref<8x128xbf16, #tpu.memory_space<vmem>>, vector<8x128xbf16>
    %c0_4 = arith.constant 0 : index
    %c0_5 = arith.constant 0 : index
    %5 = vector.load %arg5[%c0_4, %c0_5] : memref<128x128xbf16, #tpu.memory_space<vmem>>, vector<128x128xbf16>
    %cst = arith.constant dense<0.000000e+00> : vector<8x128xf32>
    %6 = tpu.matmul %4, %5, %cst {dimension_numbers = #tpu.dot_dimension_numbers<[1], [0], [0], [1], [0, 0, 1, 1], [], []>} : vector<8x128xbf16>, vector<128x128xbf16>, vector<8x128xf32> -> vector<8x128xf32>
    %7 = arith.addf %3, %6 : vector<8x128xf32>
    %c0_6 = arith.constant 0 : index
    %c0_7 = arith.constant 0 : index
    %8 = vector.load %arg8[%c0_6, %c0_7] : memref<8x128xf32, #tpu.memory_space<vmem>>, vector<8x128xf32>
    tpu.vector_store %arg8[%c0_6, %c0_7], %7 {strides = array<i32>} : memref<8x128xf32, #tpu.memory_space<vmem>>, vector<8x128xf32>,
    %c1_i32 = arith.constant 1 : i32
    %9 = arith.cmpi eq, %arg2, %c1_i32 : i32
    %10 = arith.extui %9 : i1 to i32
    %c0_i32_8 = arith.constant 0 : i32
    %11 = arith.cmpi ne, %10, %c0_i32_8 : i32
    scf.if %11 {
      %c0_9 = arith.constant 0 : index
      %c0_10 = arith.constant 0 : index
      %12 = vector.load %arg8[%c0_9, %c0_10] : memref<8x128xf32, #tpu.memory_space<vmem>>, vector<8x128xf32>
      %c0_11 = arith.constant 0 : index
      %c0_12 = arith.constant 0 : index
      %13 = vector.load %arg6[%c0_11, %c0_12] : memref<1x128xf32, #tpu.memory_space<vmem>>, vector<1x128xf32>
      %14 = vector.broadcast %13 : vector<1x128xf32> to vector<8x128xf32>
      %15 = arith.addf %12, %14 : vector<8x128xf32>
      %cst_13 = arith.constant 0.000000e+00 : f32
      %16 = vector.broadcast %cst_13 : f32 to vector<8x128xf32>
      %17 = arith.maximumf %15, %16 : vector<8x128xf32>
      %c0_14 = arith.constant 0 : index
      %c0_15 = arith.constant 0 : index
      %18 = vector.load %arg7[%c0_14, %c0_15] : memref<8x128xf32, #tpu.memory_space<vmem>>, vector<8x128xf32>
      tpu.vector_store %arg7[%c0_14, %c0_15], %17 {strides = array<i32>} : memref<8x128xf32, #tpu.memory_space<vmem>>, vector<8x128xf32>,
    } else {
    }
    return
  }
  func.func @transform_0(%arg0: i32, %arg1: i32, %arg2: i32) -> i32 {
    %c0_i32 = arith.constant 0 : i32
    %c0_i32_0 = arith.constant 0 : i32
    return %c0_i32 : i32
  }
  func.func @transform_1(%arg0: i32, %arg1: i32, %arg2: i32) -> (i32, i32) {
    %c0_i32 = arith.constant 0 : i32
    return %arg0, %arg2 : i32, i32
  }
  func.func @transform_2(%arg0: i32, %arg1: i32, %arg2: i32) -> (i32, i32) {
    %c0_i32 = arith.constant 0 : i32
    return %arg2, %arg1 : i32, i32
  }
  func.func @transform_3(%arg0: i32, %arg1: i32, %arg2: i32) -> (i32, i32) {
    %c0_i32 = arith.constant 0 : i32
    %c0_i32_0 = arith.constant 0 : i32
    return %c0_i32, %arg1 : i32, i32
  }
  func.func @transform_4(%arg0: i32, %arg1: i32, %arg2: i32) -> (i32, i32) {
    %c0_i32 = arith.constant 0 : i32
    return %arg0, %arg1 : i32, i32
  }
}

</mosaic_0001>

<bundles_post_ra>
// kernel: tpu_custom_call.1
= control target key start
LH: loop header
LB: loop body
LE: loop exit
PB: predicated region body
PF: predicated region fallthrough
CT: control target
= control target key end

     0   :  { %s1518_s0 = inlined_call_operand.hbm [shape: f32[2], index: 0, kind: input, shape index: {}]   ;;  %s1519_s1 = inlined_call_operand.hbm [shape: bf16[16,256], index: 1, kind: input, shape index: {}]   ;;  %s1520_s2 = inlined_call_operand.hbm [shape: bf16[256,256], index: 2, kind: input, shape index: {}]   ;;  %s1521_s3 = inlined_call_operand.vmem [shape: f32[1,256], index: 3, kind: input, shape index: {}]   ;;  %s1522_s4 = inlined_call_operand.hbm [shape: f32[16,256], index: 4, kind: output, shape index: {}]  }
   0x1   :  { %1546 = sst [smem:[#allocation30_spill]] %s1518_s0 }
   0x2   :  { %1547 = sst [smem:[#allocation31_spill]] %s1521_s3 }
   0x3   :  { %1548 = sst [smem:[#allocation32_spill]] %s1522_s4 }
   0x4   :  { %9 = vsyncpa [#allocation6], 0 }
   0x5   :  { %10 = vsyncpa [#allocation4], 0 }
   0x6   :  { %12 = vsyncpa [#allocation4 + $0x1], 0 }
   0x7   :  { %13 = vsyncpa [#allocation9], 0 }
   0x8   :  { %15 = vsyncpa [#allocation9 + $0x1], 0 }
   0x9   :  { %16 = vsyncpa [#allocation5], 0 }
   0xa   :  { %18 = vsyncpa [#allocation5 + $0x1], 0  ;;  %s1106_s15 = smov 0   ;;  %s1108_s16 = smov 0  }
   0xb   :  { %s1110_s17 = smov 0   ;;  %s1112_s18 = smov 0  }
   0xc   :  { %s1114_s19 = smov 0   ;;  %s1116_s20 = smov 0  }
   0xd   :  { %s1118_s21 = smov 0   ;;  %s1120_s22 = smov 0  }
   0xe   :  { %s1122_s23 = smov 0   ;;  %s1124_s24 = smov 0  }
   0xf   :  { %s1126_s25 = smov 0   ;;  %s1128_s26 = smov 0  }
  0x10   :  { %s1130_s27 = smov 0   ;;  %s1132_s28 = smov 0  }
  0x11   :  { %s1134_s29 = smov 0   ;;  %s1136_s30 = smov 0  }
  0x12 LB: > { %1549 = sst [smem:[#allocation15_spill]] %s1009_s15  ;;  %s591_s5 = sadd.s32 4294967295, %s1069_s30   ;;  %s1069_s30 = sphi %s1136_s30, %s24_s30   ;;  %s1065_s29 = sphi %s1134_s29, %s1621_s29   ;;  %s1061_s28 = sphi %s1132_s28, %s1620_s28   ;;  %s1057_s27 = sphi %s1130_s27, %s1619_s27   ;;  %s1053_s26 = sphi %s1128_s26, %s1618_s26   ;;  %s1049_s25 = sphi %s1126_s25, %s1617_s25   ;;  %s1045_s24 = sphi %s1124_s24, %s1616_s24   ;;  %s1041_s23 = sphi %s1122_s23, %s1615_s23   ;;  %s1037_s22 = sphi %s1120_s22, %s1614_s22   ;;  %s1033_s21 = sphi %s1118_s21, %s1613_s21   ;;  %s1029_s20 = sphi %s1116_s20, %s1612_s20   ;;  %s1025_s19 = sphi %s1114_s19, %s1611_s19   ;;  %s1021_s18 = sphi %s1112_s18, %s1602_s18   ;;  %s1017_s17 = sphi %s1110_s17, %s1610_s17   ;;  %s1013_s16 = sphi %s1108_s16, %s1609_s16   ;;  %s1009_s15 = sphi %s1106_s15, %s1601_s15  }
  0x13   : > { %1550 = sst [smem:[#allocation16_spill]] %s1013_s16  ;;  %s592_s6 = sadd.s32 4294967294, %s1069_s30  }
  0x14   : > { %1551 = sst [smem:[#allocation17_spill]] %s1025_s19  ;;  %p86_p0 = scmp.ne.s32.totalorder %s1037_s22, %s1033_s21 }
  0x15   : > { %1552 = sst [smem:[#allocation18_spill]] %s1037_s22  ;;  %p1185_p1 = scmp.eq.s32.totalorder %s591_s5, 0 }
  0x16   : > { %1553 = sst [smem:[#allocation19_spill]] %s1045_s24  ;;  %p114_p3 = scmp.ne.s32.totalorder %s1025_s19, %s1021_s18 }
  0x17   : > { %1554 = sst [smem:[#allocation20_spill]] %s1049_s25  ;;  %p1194_p4 = por %p1185_p1, %p86_p0 }
  0x18   : > { %1555 = sst [smem:[#allocation21_spill]] %s1053_s26  ;;  %p1201_p5 = por %p114_p3, %p1185_p1 }
  0x19   : > { %s1556_s7 = scalar_select %p1185_p1, 1, 0 }
  0x1a   : > { %s1557_s8 = scalar_select %p1194_p4, 1, 0 }
  0x1b   : > { %s1559_s10 = scalar_select %p1201_p5, 1, 0 }
  0x1c   : > { %1558 = sst [smem:[#allocation22_spill]] %s1557_s8  ;;  %p165_p6 = scmp.ne.s32.totalorder %s1017_s17, %s1013_s16 }
  0x1d   : > { %1560 = sst [smem:[#allocation23_spill]] %s1559_s10  ;;  %p166_p7 = scmp.eq.s32.totalorder %s591_s5, 7 }
  0x1e   : > { %p171_p8 = scmp.ne.s32.totalorder %s1013_s16, %s1009_s15  ;;  %p172_p9 = scmp.eq.s32.totalorder %s592_s6, 7 }
  0x1f   : > { %p593_p10 = scmp.ge.s32.totalorder %s1069_s30, 1  ;;  %p1210_p11 = por %p166_p7, %p165_p6 }
  0x20   : > { %p179_p12 = scmp.lt.s32.totalorder %s1069_s30, 9  ;;  %p1215_p13 = por %p172_p9, %p171_p8 }
  0x21   : > { %s1561_s11 = scalar_select %p1210_p11, 1, 0 }
  0x22   : > { %s1563_s12 = scalar_select %p1215_p13, 1, 0 }
  0x23   : > { %1562 = sst [smem:[#allocation24_spill]] %s1561_s11  ;;  %p1219_p0 = pnand %p593_p10, %p179_p12 }
  0x24   : > { %1564 = sst [smem:[#allocation25_spill]] %s1563_s12  ;;  %s1566_s0 = sld [smem:[#allocation30_spill]] }
  0x25   : > { %s1565_s13 = scalar_select %p1219_p0, 1, 0 }
  0x26   : > { %p664_p3 = pneg %p1219_p0 }
  0x28   : > { %p665_p2 = pnand %p664_p3, %p1185_p1 }
  0x2a   : > { %s826_s21 = scalar_lea.hbm %s1566_s0, 16  ;;  %p828_p7 = pneg %p665_p2 }
  0x2b   : > { %p827_p6 = scmp.ne.s32.totalorder %s1566_s0, %s826_s21  ;;  %p833_p10 = scmp.lt.u32.totalorder %s826_s21, %s1566_s0 }
  0x2d   : > { %p829_p8 = pnand %p828_p7, %p827_p6 }
  0x2f   : > { %p830_p9 = pneg %p829_p8 }
  0x31   : > { %p835_p12 = pnand %p833_p10, %p830_p9 }
  0x33   : > { %838 = shalt.err (!%p835_p12)
}
  0x34   : > { %s1071_s15 = smov [#allocation3]   ;;  %s36_s9 = sadd.s32 1, %s1057_s27 }
  0x35   : > { %667 = dma.hbm_to_smem (!%p665_p2), %s1566_s0, 16, %s1071_s15, [#allocation6]  }
  0x36   : > { %s39_s12 = sadd.s32 1, %s1061_s28  ;;  %p37_p3 = scmp.ge.s32.totalorder %s36_s9, 2 }
  0x37   : > { %s43_s4 = sadd.s32 1, %s1065_s29  ;;  %s73_s11 = sadd.s32 1, %s1041_s23 }
  0x38   : > { %p80_p6 = scmp.ne.s32.totalorder %s1041_s23, %s1037_s22  ;;  %s1623_s9 = smov (%p37_p3, %s36_s9), 0 }
  0x39   : > { %1567 = sst [smem:[#allocation26_spill]] %s1623_s9  ;;  %s1625_s12 = smov (!%p37_p3, %s39_s12), %s1061_s28 }
  0x3a   : > { %s69_s14 = ssub.s32 %s1057_s27, %s1623_s9  ;;  %p81_p7 = scmp.eq.s32.totalorder %s1069_s30, 0 }
  0x3b   : > { %p41_p8 = scmp.ge.s32.totalorder %s1625_s12, 2  ;;  %s101_s15 = sadd.s32 1, %s1029_s20 }
  0x3c   : > { %p1252_p2 = por %p81_p7, %p80_p6  ;;  %p1569_p9 = scmp.ne.s32.totalorder %s1029_s20, %s1025_s19 }
  0x3d   : > { %s1627_s12 = smov (%p41_p8, %s1625_s12), 0  ;;  %s1629_s4 = smov (!%p41_p8, %s43_s4), %s1065_s29 }
  0x3e   : > { %p1259_p10 = por %p1569_p9, %p81_p7  ;;  %1571 = sst [smem:[#allocation27_spill]] %s1627_s12 }
  0x3f   : > { %s97_s5 = ssub.s32 %s1061_s28, %s1627_s12  ;;  %p680_p12 = scmp.lt.s32.totalorder %s1069_s30, 8 }
  0x40   : > { %p45_p3 = scmp.ge.s32.totalorder %s1629_s4, 2  ;;  %s98_s6 = sor.u32 %s97_s5, %s69_s14 }
  0x41   : > { %p99_p6 = scmp.eq.s32.totalorder %s98_s6, 0  ;;  %s201_s0 = sand.u32 1, %s1041_s23  }
  0x42   : > { %s1631_s4 = smov (%p45_p3, %s1629_s4), 0  ;;  %s596_s3 = sshll.u32 %s201_s0, 2 }
  0x43   : > { %1572 = sst [smem:[#allocation28_spill]] %s1631_s4  ;;  %s68_s26 = ssub.s32 %s1065_s29, %s1631_s4 }
  0x44   : > { %s1273_s9 = scalar_select %p99_p6, %s1029_s20, %s101_s15  }
  0x45   : > { %s70_s24 = sor.u32 %s69_s14, %s68_s26  ;;  %s152_s12 = sor.u32 %s97_s5, %s68_s26 }
  0x46   : > { %1573 = sst [smem:[#allocation29_spill]] %s1273_s9  ;;  %p71_p7 = scmp.eq.s32.totalorder %s70_s24, 0 }
  0x47   : > { %p153_p8 = scmp.eq.s32.totalorder %s152_s12, 0  ;;  %s597_s25 = sshll.u32 %s1065_s29, 1 }
  0x48   : > { %s1279_s6 = scalar_select %p71_p7, %s1041_s23, %s73_s11  }
  0x49   : > { %s1574_s16 = sadd.s32 1, %s1017_s17  ;;  %s210_s15 = sadd.s32 %s1057_s27, %s597_s25 }
  0x4a   : > { %s1284_s10 = scalar_select %p153_p8, %s1017_s17, %s1574_s16  }
  0x4b   : > { %s598_s9 = sshll.u32 %s210_s15, 6  ;;  %s205_s19 = scalar_lea.vmem [#allocation7], %s596_s3 }
  0x4c   : > { %s214_s8 = sshll.u32 %s205_s19, 4  ;;  %s1290_s14 = scalar_lea.hbm %s1519_s1, %s598_s9  ;;  %s1292_s8 = int_to_ptr.vmem [resolvable:$true] %s214_s8 }
  0x4d   : > { %p1298_p9 = pnand %p680_p12, %p1252_p2  ;;  %s624_s3 = sshll.u32 %s1057_s27, 5 }
  0x4e   : > { %p1307_p3 = pnand %p680_p12, %p1259_p10  ;;  %s221_s22 = sand.u32 1, %s1029_s20  }
  0x4f   : > { %s202_s24 = scalar_lea.sflag [#allocation4], %s201_s0  ;;  %s839_s25 = scalar_lea.hbm %s1290_s14, 64 }
  0x50   : > { %p840_p6 = scmp.ne.s32.totalorder %s1290_s14, %s839_s25  ;;  %p841_p7 = pneg %p1298_p9 }
  0x51   : > { %s844_s12 = scalar_lea.hbm %s1519_s1, 256  ;;  %p845_p10 = scmp.lt.u32.totalorder %s1290_s14, %s1519_s1 }
  0x52   : > { %p842_p2 = pnand %p841_p7, %p840_p6  ;;  %p846_p12 = scmp.lt.u32.totalorder %s844_s12, %s839_s25 }
  0x53   : > { %p848_p11 = scmp.lt.u32.totalorder %s839_s25, %s1290_s14 }
  0x54   : > { %p843_p8 = pneg %p842_p2  ;;  %p847_p13 = por %p846_p12, %p845_p10 }
  0x56   : > { %p849_p5 = por %p848_p11, %p847_p13 }
  0x58   : > { %p850_p4 = pnand %p849_p5, %p843_p8 }
  0x5a   : > { %853 = shalt.err (!%p850_p4)
}
  0x5b   : > { %s854_s0 = scalar_lea.vmem %s1292_s8, 64  ;;  %s1072_s18 = smov [#allocation7]  }
  0x5c   : > { %p855_p6 = scmp.ne.s32.totalorder %s1292_s8, %s854_s0  ;;  %s859_s21 = sshll.u32 %s1072_s18, 4  ;;  %s860_s21 = int_to_ptr.vmem [resolvable:$false] %s859_s21 }
  0x5d   : > { %s861_s5 = scalar_lea.vmem %s860_s21, 128  ;;  %p862_p0 = scmp.lt.s32.totalorder %s1292_s8, %s860_s21 }
  0x5e   : > { %p857_p2 = pnand %p855_p6, %p841_p7  ;;  %p863_p10 = scmp.lt.s32.totalorder %s861_s5, %s854_s0 }
  0x60   : > { %p858_p1 = pneg %p857_p2  ;;  %p864_p12 = por %p863_p10, %p862_p0 }
  0x62   : > { %p865_p11 = pnand %p864_p12, %p858_p1 }
  0x64   : > { %868 = shalt.err (!%p865_p11)
}
  0x65   : > { %671 = dma.hbm_to_vmem [thread:$0]  (!%p1298_p9), %s1290_s14, 64, %s1292_s8, %s202_s24  }
  0x66   : > { %s599_s15 = sshll.u32 %s221_s22, 6  ;;  %s231_s25 = sadd.s32 %s1061_s28, %s624_s3 }
  0x67   : > { %s602_s26 = sshll.u32 %s231_s25, 6  ;;  %s225_s9 = scalar_lea.vmem [#allocation8], %s599_s15 }
  0x68   : > { %s234_s12 = sshll.u32 %s225_s9, 4  ;;  %s1345_s16 = scalar_lea.hbm %s1520_s2, %s602_s26  ;;  %s1347_s12 = int_to_ptr.vmem [resolvable:$true] %s234_s12 }
  0x69   : > { %s1351_s8 = scalar_lea.sflag [#allocation9], %s221_s22  ;;  %s869_s14 = scalar_lea.hbm %s1345_s16, 1024 }
  0x6a   : > { %p870_p1 = scmp.ne.s32.totalorder %s1345_s16, %s869_s14  ;;  %p871_p4 = pneg %p1307_p3 }
  0x6b   : > { %s874_s0 = scalar_lea.hbm %s1520_s2, 4096  ;;  %p875_p0 = scmp.lt.u32.totalorder %s1345_s16, %s1520_s2 }
  0x6c   : > { %p872_p5 = pnand %p871_p4, %p870_p1  ;;  %p876_p9 = scmp.lt.u32.totalorder %s874_s0, %s869_s14 }
  0x6d   : > { %p878_p8 = scmp.lt.u32.totalorder %s869_s14, %s1345_s16 }
  0x6e   : > { %p873_p13 = pneg %p872_p5  ;;  %p877_p7 = por %p876_p9, %p875_p0 }
  0x70   : > { %p879_p6 = por %p878_p8, %p877_p7 }
  0x72   : > { %p880_p2 = pnand %p879_p6, %p873_p13 }
  0x74   : > { %883 = shalt.err (!%p880_p2)
}
  0x75   : > { %s884_s22 = scalar_lea.vmem %s1347_s12, 1024  ;;  %s1073_s5 = smov [#allocation8]  }
  0x76   : > { %p885_p10 = scmp.ne.s32.totalorder %s1347_s12, %s884_s22  ;;  %s889_s15 = sshll.u32 %s1073_s5, 4  ;;  %s890_s15 = int_to_ptr.vmem [resolvable:$false] %s889_s15 }
  0x77   : > { %s891_s25 = scalar_lea.vmem %s890_s15, 2048  ;;  %p892_p1 = scmp.lt.s32.totalorder %s1347_s12, %s890_s15 }
  0x78   : > { %p887_p12 = pnand %p885_p10, %p871_p4  ;;  %p893_p5 = scmp.lt.s32.totalorder %s891_s25, %s884_s22 }
  0x7a   : > { %p888_p11 = pneg %p887_p12  ;;  %p894_p0 = por %p893_p5, %p892_p1 }
  0x7c   : > { %p895_p9 = pnand %p894_p0, %p888_p11 }
  0x7e   : > { %898 = shalt.err (!%p895_p9)
}
  0x7f   : > { %s1074_s26 = smov 128   ;;  %s1075_s9 = smov 64  }
  0x80   : > { %s1076_s4 = smov 4   ;;  %p1577_p4 = scmp.ne.s32.totalorder %s1565_s13, 0 }
  0x81   : > { %674 = dma.hbm_to_vmem [thread:$0]  (!%p1307_p3), %s1345_s16, 1024, %s1347_s12, %s1351_s8, %s1074_s26, %s1075_s9, %s1076_s4  }
  0x82   : > { %252 = sbr.rel (%p1577_p4) target bundleno = 464 (0x1d0), region = 36  ;;  %p1578_p13 = scmp.ne.s32.totalorder (!%p1577_p4), %s1556_s7, 0 }
  0x89   : > { %992 = dma.done.wait (%p1578_p13), [#allocation6], 16  }
  0x8a   : > { %994 = vsyncadd (%p1578_p13), [#allocation6], 4294967280  ;;  %s1579_s11 = sld [smem:[#allocation18_spill]]  ;;  %s1580_s14 = sld [smem:[#allocation22_spill]] }
  0x90   : > { %s258_s3 = sand.u32 1, %s1579_s11   ;;  %p1581_p7 = scmp.ne.s32.totalorder %s1580_s14, 0 }
  0x91   : > { %s1386_s24 = sshll.u32 %s258_s3, 2  ;;  %s259_s0 = scalar_lea.sflag [#allocation4], %s258_s3 }
  0x92   : > { %s262_s18 = scalar_lea.vmem [#allocation7], %s1386_s24 }
  0x93   : > { %996 = dma.done.wait (%p1581_p7), %s259_s0, 64  }
  0x94   : > { %998 = vsyncadd (%p1581_p7), %s259_s0, 4294967232  ;;  %s1582_s13 = sld [smem:[#allocation17_spill]]  ;;  %s1583_s19 = sld [smem:[#allocation23_spill]] }
  0x9a   : > { %s267_s12 = sand.u32 1, %s1582_s13   ;;  %p1584_p3 = scmp.ne.s32.totalorder %s1583_s19, 0 }
  0x9b   : > { %s606_s16 = sshll.u32 %s267_s12, 6  ;;  %s268_s8 = scalar_lea.sflag [#allocation9], %s267_s12 }
  0x9c   : > { %s1394_s7 = scalar_lea.vmem [#allocation8], %s606_s16 }
  0x9d   : > { %1000 = dma.done.wait (%p1584_p3), %s268_s8, 1024  }
  0x9e   : > { %1002 = vsyncadd (%p1584_p3), %s268_s8, 4294966272 }
  0x9f   : > { %276 = sfence }
  0xa0   : > { %s1585_s21 = sld [smem:[#allocation16_spill]]  ;;  %s1586_s22 = sld [smem:[#allocation20_spill]] }
  0xa1   : > { %s1587_s9 = sld [smem:[#allocation31_spill]]  ;;  %s1588_s14 = sld [smem:[#allocation19_spill]] }
  0xa6   : > { %s302_s5 = sand.u32 1, %s1585_s21   ;;  %p306_p8 = scmp.lt.s32.totalorder %s1586_s22, 1 }
  0xa7   : > { %s1404_s15 = sshll.u32 %s302_s5, 3  ;;  %p608_p6 = scmp.ne.s32.totalorder %s1588_s14, 0 }
  0xa8   : > { %s1633_s22 = smov (!%p306_p8, %s1586_s22), 1  ;;  %s304_s11 = scalar_lea.vmem [#allocation10], %s1404_s15  ;;  %v1077_v0 = vmov (!%p608_p6), 0.0  }
  0xa9   : > { %s308_s4 = scalar_lea.vmem %s1587_s9, %s1633_s22  ;;  %313 = sbr.rel (%p608_p6) target bundleno = 176 (0xb0), region = 52  ;;  %314 = vst [vmem:[#allocation2] sm:$0xff] (!%p608_p6), %v1077_v0 }
  0xb0 PF: > { %v818_v1 = vld [vmem:[%s1394_s7] sm:$0xff]   ;;  %v1078_v2 = vmov 0.0   ;;  %v819_v3 = vld [vmem:[%s1394_s7 + $0x8] sm:$0xff]   ;;  %vm1079_vm0 = vmmov 0   ;;  %v820_v4 = vld [vmem:[%s1394_s7 + $0x10] sm:$0xff]   ;;  %s1589_s3 = sld [smem:[#allocation19_spill]] }
  0xb1   : > { %634 = vmatprep.subr.bf16.mxu0 %v1078_v2  ;;  %650 = vmatprep.mubr.msk.bf16.mxu0 %vm1079_vm0, %v1078_v2  ;;  %v821_v5 = vld [vmem:[%s1394_s7 + $0x18] sm:$0xff]   ;;  %v822_v6 = vld [vmem:[%s1394_s7 + $0x20] sm:$0xff]   ;;  %v823_v7 = vld [vmem:[%s1394_s7 + $0x28] sm:$0xff]  }
  0xb2   : > { %635 = vmatpush3.bf16.msra.mxu0 %v818_v1  ;;  %v824_v8 = vld [vmem:[%s1394_s7 + $0x30] sm:$0xff]   ;;  %v825_v9 = vld [vmem:[%s1394_s7 + $0x38] sm:$0xff]  }
  0xb3   : > { %636 = vmatprep.subr.bf16.mxu0 %v1078_v2  ;;  %v316_v10 = vld [vmem:[%s262_s18] sm:$0xf]  ;;  %v315_v11 = vld [vmem:[#allocation2] sm:$0xff] }
  0xb6   : > { %637 = vmatpush3.bf16.msra.mxu0 %v819_v3  ;;  %p617_p2 = scmp.ne.s32.totalorder %s1589_s3, 1 }
  0xb7   : > { %638 = vmatprep.subr.bf16.mxu0 %v1078_v2  ;;  %v618_v18 = vld [vmem:[%s308_s4] ss:$0 sm:$0xff] (!%p617_p2) }
  0xba   : > { %639 = vmatpush3.bf16.msra.mxu0 %v820_v4 }
  0xbb   : > { %640 = vmatprep.subr.bf16.mxu0 %v1078_v2 }
  0xbe   : > { %641 = vmatpush3.bf16.msra.mxu0 %v821_v5 }
  0xbf   : > { %642 = vmatprep.subr.bf16.mxu0 %v1078_v2 }
  0xc2   : > { %643 = vmatpush3.bf16.msra.mxu0 %v822_v6 }
  0xc3   : > { %644 = vmatprep.subr.bf16.mxu0 %v1078_v2 }
  0xc6   : > { %645 = vmatpush3.bf16.msra.mxu0 %v823_v7 }
  0xc7   : > { %646 = vmatprep.subr.bf16.mxu0 %v1078_v2 }
  0xca   : > { %647 = vmatpush3.bf16.msra.mxu0 %v824_v8 }
  0xcb   : > { %648 = vmatprep.subr.bf16.mxu0 %v1078_v2 }
  0xce   : > { %649 = vmatpush3.bf16.msra.mxu0 %v825_v9 }
  0xd1   : > { %651 = vmatmul.mubr.bf16.vlgmr.msra.gmra.mrb[0].mxu0 %v316_v10 }
 0x1a1   : > { %426 = sbr.rel (%p617_p2) target bundleno = 436 (0x1b4), region = 56 }
 0x1a4   : > { %v415_v12 = vpop.f32.mrb[0].mxu0 }
 0x1a5   : > { %v421_v13 = vadd.f32 %v415_v12, %v315_v11  ;;  %v652_v14 = vpop.f32.mrb[1].mxu0 }
 0x1a6   : > { %v418_v15 = vpop.f32.mrb[2].mxu0 }
 0x1a7   : > { %422 = vst [vmem:[#allocation2] sm:$0xff] %v421_v13  ;;  %v653_v16 = vpop.f32.mrb[3].mxu0 }
 0x1ae   : > { %v427_v17 = vld [vmem:[#allocation2] sm:$0xff] }
 0x1af   : > { %v435_v19 = vadd.f32 %v618_v18, %v427_v17 }
 0x1b1   : > { %v436_v20 = vmax.f32 %v435_v19, 0.0 }
 0x1b3   : > { %437 = vst [vmem:[%s304_s11] sm:$0xff] %v436_v20 }
 0x1b4 PF: > { %s1591_s24 = sld [smem:[#allocation21_spill]]  ;;  %s1592_s18 = sld [smem:[#allocation20_spill]] }
 0x1b5   : > { %s1594_s16 = sld [smem:[#allocation24_spill]]  ;;  %s454_s21 = sshll.u32 %s304_s11, 4  ;;  %s1437_s21 = int_to_ptr.vmem [resolvable:$true] %s454_s21 }
 0x1b6   : > { %s1595_s9 = sld [smem:[#allocation32_spill]]  ;;  %s439_s14 = scalar_lea.sflag [#allocation5], %s302_s5 }
 0x1b7   : > { %s899_s3 = scalar_lea.vmem %s1437_s21, 128  ;;  %s1080_s0 = smov [#allocation10]  }
 0x1b8   : > { %p900_p10 = scmp.ne.s32.totalorder %s1437_s21, %s899_s3  ;;  %s903_s15 = sshll.u32 %s1080_s0, 4  ;;  %s904_s15 = int_to_ptr.vmem [resolvable:$false] %s903_s15 }
 0x1b9   : > { %s905_s11 = scalar_lea.vmem %s904_s15, 256  ;;  %p906_p5 = scmp.lt.s32.totalorder %s1437_s21, %s904_s15 }
 0x1ba   : > { %s620_s8 = sshll.u32 %s1591_s24, 1  ;;  %p907_p0 = scmp.lt.s32.totalorder %s905_s11, %s899_s3 }
 0x1bb   : > { %s450_s7 = sadd.s32 %s1592_s18, %s620_s8  ;;  %p1596_p12 = scmp.ne.s32.totalorder %s1594_s16, 0 }
 0x1bc   : > { %s621_s25 = sshll.u32 %s450_s7, 7  ;;  %p908_p9 = por %p907_p0, %p906_p5 }
 0x1bd   : > { %s452_s4 = scalar_lea.hbm %s1595_s9, %s621_s25  ;;  %p901_p11 = pnand %p900_p10, %p1596_p12 }
 0x1bf   : > { %p902_p1 = pneg %p901_p11 }
 0x1c1   : > { %p909_p4 = pnand %p908_p9, %p902_p1 }
 0x1c3   : > { %912 = shalt.err (!%p909_p4)
}
 0x1c4   : > { %s913_s13 = scalar_lea.hbm %s452_s4, 128  ;;  %s917_s24 = scalar_lea.hbm %s1595_s9, 512 }
 0x1c5   : > { %p914_p13 = scmp.ne.s32.totalorder %s452_s4, %s913_s13  ;;  %p918_p8 = scmp.lt.u32.totalorder %s452_s4, %s1595_s9 }
 0x1c6   : > { %p919_p6 = scmp.lt.u32.totalorder %s917_s24, %s913_s13  ;;  %p921_p10 = scmp.lt.u32.totalorder %s913_s13, %s452_s4 }
 0x1c7   : > { %p915_p7 = pnand %p914_p13, %p1596_p12 }
 0x1c8   : > { %p920_p2 = por %p919_p6, %p918_p8 }
 0x1c9   : > { %p916_p3 = pneg %p915_p7 }
 0x1ca   : > { %p922_p11 = por %p921_p10, %p920_p2 }
 0x1cc   : > { %p923_p1 = pnand %p922_p11, %p916_p3 }
 0x1ce   : > { %926 = shalt.err (!%p923_p1)
}
 0x1cf   : > { %662 = dma.vmem_to_hbm [thread:$0]  (%p1596_p12), %s1437_s21, 128, %s452_s4, %s439_s14  }
 0x1d0 PF: > { %s1597_s8 = sld [smem:[#allocation15_spill]]  ;;  %s1598_s7 = sld [smem:[#allocation25_spill]] }
 0x1d1   : > { %p682_p5 = scmp.ge.s32.totalorder %s1069_s30, 2 }
 0x1d6   : > { %s466_s25 = sand.u32 1, %s1597_s8   ;;  %p1599_p0 = scmp.ne.s32.totalorder %s1598_s7, 0 }
 0x1d7   : > { %s467_s22 = scalar_lea.sflag [#allocation5], %s466_s25 }
 0x1d8   : > { %p676_p9 = pnand %p682_p5, %p1599_p0 }
 0x1da   : > { %1004 = dma.done.wait (!%p676_p9), %s467_s22, 128  }
 0x1db   : > { %1006 = vsyncadd (!%p676_p9), %s467_s22, 4294967168  ;;  %s24_s30 = sadd.s32 1, %s1069_s30   ;;  %s1601_s15 = sld [smem:[#allocation16_spill]] }
 0x1dc   : > { %p1465_p4 = scmp.ge.s32.totalorder %s24_s30, 10   ;;  %s1602_s18 = sld [smem:[#allocation17_spill]] }
 0x1dd   : > { %s1603_s21 = sld [smem:[#allocation29_spill]]  ;;  %s1604_s4 = sld [smem:[#allocation18_spill]] }
 0x1de   : > { %s1605_s14 = sld [smem:[#allocation26_spill]]  ;;  %s1606_s3 = sld [smem:[#allocation27_spill]] }
 0x1df   : > { %s1607_s0 = sld [smem:[#allocation28_spill]]  ;;  %s1609_s16 = smov %s1017_s17 }
 0x1e0   : > { %s1610_s17 = smov %s1284_s10  ;;  %s1611_s19 = smov %s1029_s20 }
 0x1e1   : > { %s1614_s22 = smov %s1041_s23  ;;  %s1615_s23 = smov %s1279_s6 }
 0x1e2   : > { %s1616_s24 = smov %s1057_s27  ;;  %s1617_s25 = smov %s1061_s28 }
 0x1e3   : > { %s1612_s20 = smov %s1603_s21  ;;  %s1613_s21 = smov %s1604_s4 }
 0x1e4   : > { %s1618_s26 = smov %s1065_s29  ;;  %s1619_s27 = smov %s1605_s14 }
 0x1e5   : > { %s1620_s28 = smov %s1606_s3  ;;  %s1621_s29 = smov %s1607_s0 }
 0x1e6   :  { %23 = sbr.rel (!%p1465_p4) target bundleno = 18 (0x12), region = 110 }
 0x1ed   :  { %472 = vsyncpa [#allocation4], 1 }
 0x1ee   :  { %474 = vsyncpa [#allocation4 + $0x1], 1 }
 0x1ef   :  { %475 = vsyncpa [#allocation9], 1 }
 0x1f0   :  { %477 = vsyncpa [#allocation9 + $0x1], 1 }
 0x1f1   :  { %478 = vsyncpa [#allocation5], 1 }
 0x1f2   :  { %480 = vsyncpa [#allocation5 + $0x1], 1 }
 0x1f3   :  { %481 = vsyncpa [#allocation6], 1 }
 0x1f4   :  { %483 = vsyncpa [#allocation6 + $0x1], 1 }

</bundles_post_ra>
